<compile_context>
chip_gen: v5e
topology: v5e:2x2
jax: 0.10.0
libtpu: 0.0.40
codegen_flags: <defaults>
</compile_context>

<pallas_src>
import functools

import jax
import jax.numpy as jnp
from jax.experimental import pallas as pl
from jax.experimental.pallas import tpu as pltpu

GLOBAL_EPS = 1e-6   # Global.eps (assumed)
PD_EPS = 1e-6       # nn.PairwiseDistance(eps=1e-06)

LANE = 128
ROW_ALIGN = 32              # sublane-safe row multiple for f32/bf16/int8/fp8 blocks
DEFAULT_BLOCK_ROWS = 2048   # 2048x128 f32 tile = 1 MiB


def _round_up(x, m):
    return (x + m - 1) // m * m


def invloss_kernel(x1_ref, x2_ref, simil_ref, out_ref, acc_ref, *, param):
    """Grid axis 0 walks (block_rows, 128) tiles of the flattened inputs (reduction axis)."""
    i = pl.program_id(0)

    @pl.when(i == 0)
    def _():
        acc_ref[...] = jnp.zeros_like(acc_ref)

    # Hot path: pure-VPU elementwise squared-difference accumulate, hidden under the DMAs.
    d = x1_ref[...].astype(jnp.float32) - x2_ref[...].astype(jnp.float32) + jnp.float32(PD_EPS)
    acc_ref[...] += d * d

    @pl.when(i == pl.num_programs(0) - 1)
    def _():
        dist_sq = jnp.sum(acc_ref[...])           # single cross-lane/sublane reduce (epilogue)
        one = jnp.float32(1.0 + GLOBAL_EPS)       # torch.as_tensor(np.ones(1) + Global.eps)
        sim = one / (one + dist_sq)               # div(one, addcmul(one, 1, dist, dist))
        tgt = simil_ref[0]
        # F.kl_div(sim, similarity), reduction='mean' over the single element
        kl = tgt * (jnp.log(tgt) - sim)
        # F.mse_loss(sim, similarity), reduction='mean' over the single element
        mse = (sim - tgt) * (sim - tgt)
        out_ref[0] = kl + jnp.float32(param) * mse


def inv_loss(input1, input2, similarity, param, *, block_rows=DEFAULT_BLOCK_ROWS):
    # Keep native dtype (no wrapper up-cast => no extra HBM traffic); kernel casts to f32.
    x1 = input1.reshape(-1)
    x2 = input2.reshape(-1)
    n = x1.shape[0]

    rows = (n + LANE - 1) // LANE
    block_rows = min(block_rows, _round_up(rows, ROW_ALIGN))
    block_rows = _round_up(block_rows, ROW_ALIGN)
    padded_rows = _round_up(rows, block_rows)
    padded_n = padded_rows * LANE

    if padded_n != n:
        # Pad x1 with 0 and x2 with PD_EPS so each padded element contributes
        # (0 - eps + eps)^2 == 0 to the squared distance (exact for f32 inputs).
        x1 = jnp.pad(x1, (0, padded_n - n), constant_values=0.0)
        x2 = jnp.pad(x2, (0, padded_n - n), constant_values=PD_EPS)
    x1 = x1.reshape(padded_rows, LANE)
    x2 = x2.reshape(padded_rows, LANE)
    sim_t = similarity.reshape(1).astype(jnp.float32)

    kern = functools.partial(invloss_kernel, param=float(param))
    out = pl.pallas_call(
        kern,
        out_shape=jax.ShapeDtypeStruct((1,), jnp.float32),
        grid_spec=pltpu.PrefetchScalarGridSpec(
            num_scalar_prefetch=0,
            grid=(padded_rows // block_rows,),
            in_specs=[
                pl.BlockSpec((block_rows, LANE), lambda i: (i, 0)),
                pl.BlockSpec((block_rows, LANE), lambda i: (i, 0)),
                pl.BlockSpec(memory_space=pltpu.MemorySpace.SMEM),  # similarity scalar
            ],
            out_specs=pl.BlockSpec(memory_space=pltpu.MemorySpace.SMEM),
            scratch_shapes=[pltpu.VMEM((block_rows, LANE), jnp.float32)],
        ),
        compiler_params=pltpu.CompilerParams(
            dimension_semantics=("arbitrary",),
            vmem_limit_bytes=32 * 1024 * 1024,
        ),
    )(x1, x2, sim_t)
    return out[0]


def inv_loss_ref(input1, input2, similarity, param):
    """Plain-JAX reference mirroring the PyTorch forward (for sanity check)."""
    x1 = input1.reshape(-1).astype(jnp.float32)
    x2 = input2.reshape(-1).astype(jnp.float32)
    dist_sq = jnp.sum((x1 - x2 + jnp.float32(PD_EPS)) ** 2)
    one = jnp.float32(1.0 + GLOBAL_EPS)
    sim = one / (one + dist_sq)
    tgt = similarity.reshape(()).astype(jnp.float32)
    kl = tgt * (jnp.log(tgt) - sim)
    mse = (sim - tgt) ** 2
    return kl + jnp.float32(param) * mse


if __name__ == "__main__":
    key = jax.random.PRNGKey(0)
    k1, k2, k3, k4 = jax.random.split(key, 4)

    # shapes consistent with an NCHW feature map fed through .view(1, -1)
    input1 = jax.random.normal(k1, (2, 4, 16, 16), dtype=jnp.float32)
    input2 = jax.random.normal(k2, (2, 4, 16, 16), dtype=jnp.float32)
    similarity = jnp.array([0.7], dtype=jnp.float32)
    param = 0.5  # self.param, chosen deterministically

    out = jax.block_until_ready(inv_loss(input1, input2, similarity, param))
    ref = inv_loss_ref(input1, input2, similarity, param)
    assert jnp.allclose(out, ref, rtol=1e-5, atol=1e-6), (out, ref)

    # second case: exercises multi-step reduction grid + the padding path
    a = jax.random.normal(k3, (2, 8, 48, 48), dtype=jnp.float32)
    b = jax.random.normal(k4, (2, 8, 48, 48), dtype=jnp.float32)
    out2 = jax.block_until_ready(inv_loss(a, b, similarity, param, block_rows=128))
    ref2 = inv_loss_ref(a, b, similarity, param)
    assert jnp.allclose(out2, ref2, rtol=1e-5, atol=1e-6), (out2, ref2)

    print("KERNEL_OK")
</pallas_src>

<mosaic_0001>
module attributes {stable_mosaic.version = 11 : i64} {
  func.func @invloss_kernel(%arg0: i32, %arg1: memref<32x128xf32, #tpu.memory_space<vmem>>, %arg2: memref<32x128xf32, #tpu.memory_space<vmem>>, %arg3: memref<1xf32, #tpu.memory_space<smem>>, %arg4: memref<1xf32, #tpu.memory_space<smem>>, %arg5: memref<32x128xf32, #tpu.memory_space<vmem>>) attributes {dimension_semantics = [#tpu.dimension_semantics<arbitrary>], iteration_bounds = array<i64: 1>, scalar_prefetch = 0 : i64, scratch_operands = 1 : i64, tpu.core_type = #tpu.core_type<tc>, window_params = [{transform_indices = @transform_0, window_bounds = array<i64: 32, 128>}, {transform_indices = @transform_1, window_bounds = array<i64: 32, 128>}, {transform_indices = @transform_2, window_bounds = array<i64: 1>}, {transform_indices = @transform_3, window_bounds = array<i64: 1>}]} {
    %c0_i32 = arith.constant 0 : i32
    %0 = arith.cmpi eq, %arg0, %c0_i32 : i32
    %1 = arith.extui %0 : i1 to i32
    %c0_i32_0 = arith.constant 0 : i32
    %2 = arith.cmpi ne, %1, %c0_i32_0 : i32
    scf.if %2 {
      %cst_10 = arith.constant 0.000000e+00 : f32
      %15 = vector.broadcast %cst_10 : f32 to vector<32x128xf32>
      %c0_11 = arith.constant 0 : index
      %c0_12 = arith.constant 0 : index
      %16 = vector.load %arg5[%c0_11, %c0_12] : memref<32x128xf32, #tpu.memory_space<vmem>>, vector<32x128xf32>
      tpu.vector_store %arg5[%c0_11, %c0_12], %15 {strides = array<i32>} : memref<32x128xf32, #tpu.memory_space<vmem>>, vector<32x128xf32>,
    } else {
    }
    %c0 = arith.constant 0 : index
    %c0_1 = arith.constant 0 : index
    %3 = vector.load %arg1[%c0, %c0_1] : memref<32x128xf32, #tpu.memory_space<vmem>>, vector<32x128xf32>
    %c0_2 = arith.constant 0 : index
    %c0_3 = arith.constant 0 : index
    %4 = vector.load %arg2[%c0_2, %c0_3] : memref<32x128xf32, #tpu.memory_space<vmem>>, vector<32x128xf32>
    %5 = arith.subf %3, %4 : vector<32x128xf32>
    %cst = arith.constant 9.99999997E-7 : f32
    %6 = vector.broadcast %cst : f32 to vector<32x128xf32>
    %7 = arith.addf %5, %6 : vector<32x128xf32>
    %c0_4 = arith.constant 0 : index
    %c0_5 = arith.constant 0 : index
    %8 = vector.load %arg5[%c0_4, %c0_5] : memref<32x128xf32, #tpu.memory_space<vmem>>, vector<32x128xf32>
    %9 = arith.mulf %7, %7 : vector<32x128xf32>
    %10 = arith.addf %8, %9 : vector<32x128xf32>
    %c0_6 = arith.constant 0 : index
    %c0_7 = arith.constant 0 : index
    %11 = vector.load %arg5[%c0_6, %c0_7] : memref<32x128xf32, #tpu.memory_space<vmem>>, vector<32x128xf32>
    tpu.vector_store %arg5[%c0_6, %c0_7], %10 {strides = array<i32>} : memref<32x128xf32, #tpu.memory_space<vmem>>, vector<32x128xf32>,
    %c0_i32_8 = arith.constant 0 : i32
    %12 = arith.cmpi eq, %arg0, %c0_i32_8 : i32
    %13 = arith.extui %12 : i1 to i32
    %c0_i32_9 = arith.constant 0 : i32
    %14 = arith.cmpi ne, %13, %c0_i32_9 : i32
    scf.if %14 {
      %c0_10 = arith.constant 0 : index
      %c0_11 = arith.constant 0 : index
      %15 = vector.load %arg5[%c0_10, %c0_11] : memref<32x128xf32, #tpu.memory_space<vmem>>, vector<32x128xf32>
      %16 = vector.shape_cast %15 : vector<32x128xf32> to vector<1x32x128xf32>
      %cst_12 = arith.constant dense<0.000000e+00> : vector<1xf32>
      %17 = vector.multi_reduction <add>, %16, %cst_12 [1, 2] : vector<1x32x128xf32> to vector<1xf32>
      %18 = vector.shape_cast %17 : vector<1xf32> to vector<1x1x1xf32>
      %19 = vector.extract %18[0, 0, 0] : f32 from vector<1x1x1xf32>
      %cst_13 = arith.constant 1.00000095 : f32
      %20 = arith.addf %cst_13, %19 : f32
      %cst_14 = arith.constant 1.00000095 : f32
      %21 = arith.divf %cst_14, %20 : f32
      %c0_15 = arith.constant 0 : index
      %22 = memref.load %arg3[%c0_15] : memref<1xf32, #tpu.memory_space<smem>>
      %23 = math.log %22 : f32
      %24 = arith.subf %23, %21 : f32
      %25 = arith.mulf %22, %24 : f32
      %26 = arith.subf %21, %22 : f32
      %27 = arith.subf %21, %22 : f32
      %28 = arith.mulf %26, %27 : f32
      %cst_16 = arith.constant 5.000000e-01 : f32
      %29 = arith.mulf %cst_16, %28 : f32
      %30 = arith.addf %25, %29 : f32
      %c0_17 = arith.constant 0 : index
      %31 = memref.load %arg4[%c0_17] : memref<1xf32, #tpu.memory_space<smem>>
      memref.store %30, %arg4[%c0_17] : memref<1xf32, #tpu.memory_space<smem>>
    } else {
    }
    return
  }
  func.func @transform_0(%arg0: i32) -> (i32, i32) {
    %c0_i32 = arith.constant 0 : i32
    %c0_i32_0 = arith.constant 0 : i32
    return %arg0, %c0_i32 : i32, i32
  }
  func.func @transform_1(%arg0: i32) -> (i32, i32) {
    %c0_i32 = arith.constant 0 : i32
    %c0_i32_0 = arith.constant 0 : i32
    return %arg0, %c0_i32 : i32, i32
  }
  func.func @transform_2(%arg0: i32) -> i32 {
    %c0_i32 = arith.constant 0 : i32
    %c0_i32_0 = arith.constant 0 : i32
    return %c0_i32 : i32
  }
  func.func @transform_3(%arg0: i32) -> i32 {
    %c0_i32 = arith.constant 0 : i32
    %c0_i32_0 = arith.constant 0 : i32
    return %c0_i32 : i32
  }
}

</mosaic_0001>

<bundles_post_ra>
// kernel: tpu_custom_call.1
= control target key start
LH: loop header
LB: loop body
LE: loop exit
PB: predicated region body
PF: predicated region fallthrough
CT: control target
= control target key end

     0   :  { %9 = vsyncpa [#allocation5], 0  ;;  %s279_s0 = inlined_call_operand.hbm [shape: f32[32,128], index: 0, kind: input, shape index: {}]   ;;  %s280_s1 = inlined_call_operand.hbm [shape: f32[32,128], index: 1, kind: input, shape index: {}]   ;;  %s281_s2 = inlined_call_operand.<no memory space> [shape: f32[1], index: 2, kind: input, shape index: {}]   ;;  %s282_s3 = inlined_call_operand.hbm [shape: f32[1], index: 3, kind: output, shape index: {}]  }
   0x1   :  { %10 = vsyncpa [#allocation8], 0 }
   0x2   :  { %11 = vsyncpa [#allocation6], 0  ;;  %s16_s14 = sshll.u32 %s279_s0, 4  ;;  %s236_s15 = smov [#allocation4]   ;;  %s17_s14 = int_to_ptr.hbm [resolvable:$true] %s16_s14 }
   0x3   :  { %s18_s16 = sshll.u32 %s236_s15, 4  ;;  %s29_s19 = sshll.u32 %s280_s1, 4  ;;  %s19_s16 = int_to_ptr.vmem [resolvable:$true] %s18_s16  ;;  %s30_s19 = int_to_ptr.hbm [resolvable:$true] %s29_s19 }
   0x4   :  { %s237_s20 = smov 128   ;;  %s238_s21 = smov 8  }
   0x5   :  { %24 = dma.hbm_to_vmem [thread:$0]  %s17_s14, 512, %s19_s16, [#allocation5], %s237_s20, %s237_s20, %s238_s21  }
   0x6   :  { %s239_s22 = smov [#allocation7]  }
   0x7   :  { %s31_s23 = sshll.u32 %s239_s22, 4  ;;  %s32_s23 = int_to_ptr.vmem [resolvable:$true] %s31_s23 }
   0x8   :  { %37 = dma.hbm_to_vmem [thread:$0]  %s30_s19, 512, %s32_s23, [#allocation8], %s237_s20, %s237_s20, %s238_s21  }
   0x9   :  { %230 = dma.done.wait [#allocation5], 512  }
   0xa   :  { %231 = vsyncadd [#allocation5], 4294966784 }
   0xb   :  { %232 = dma.done.wait [#allocation8], 512  }
   0xc   :  { %233 = vsyncadd [#allocation8], 4294966784  ;;  %v56_v0 = vld [vmem:[#allocation4] sm:$0xff]  ;;  %v57_v1 = vld [vmem:[#allocation4 + $0x8] sm:$0xff]  ;;  %v126_v31 = vstv %s281_s2  ;;  %s143_s12 = sshll.u32 %s282_s3, 4  ;;  %s240_s15 = smov [#allocation9]   ;;  %s144_s12 = int_to_ptr.hbm [resolvable:$true] %s143_s12 }
   0xd   :  { %v58_v2 = vld [vmem:[#allocation4 + $0x10] sm:$0xff]  ;;  %v59_v3 = vld [vmem:[#allocation4 + $0x18] sm:$0xff]  ;;  %v60_v4 = vld [vmem:[#allocation7] sm:$0xff] }
   0xe   :  { %v61_v5 = vld [vmem:[#allocation7 + $0x8] sm:$0xff]  ;;  %v62_v6 = vld [vmem:[#allocation7 + $0x10] sm:$0xff]  ;;  %v63_v7 = vld [vmem:[#allocation7 + $0x18] sm:$0xff]  ;;  %v64_v8 = vsub.f32 %v56_v0, %v60_v4 }
   0xf   :  { %v65_v9 = vsub.f32 %v57_v1, %v61_v5  ;;  %v66_v10 = vsub.f32 %v58_v2, %v62_v6  ;;  %v67_v11 = vsub.f32 %v59_v3, %v63_v7 }
  0x10   :  { %v68_v12 = vadd.f32 1e-06, %v64_v8 }
  0x11   :  { %v69_v13 = vadd.f32 1e-06, %v65_v9  ;;  %v70_v14 = vadd.f32 1e-06, %v66_v10  ;;  %v71_v15 = vadd.f32 1e-06, %v67_v11 }
  0x12   :  { %v76_v16 = vmul.f32 %v68_v12, %v68_v12 }
  0x13   :  { %v77_v17 = vmul.f32 %v69_v13, %v69_v13  ;;  %v78_v18 = vmul.f32 %v70_v14, %v70_v14  ;;  %v79_v19 = vmul.f32 %v71_v15, %v71_v15 }
  0x15   :  { %v95_v20 = vadd.f32 %v77_v17, %v76_v16 }
  0x17   :  { %v96_v21 = vadd.f32 %v95_v20, %v78_v18 }
  0x19   :  { %v97_v22 = vadd.f32 %v96_v21, %v79_v19 }
  0x1b   :  { %98 = vadd.xlane.f32.xlu0 %v97_v22 }
  0x8e   :  { %v99_v23 = vpop.xlane.xlu0 %98 }
  0x8f   :  { %v100_v24 = vrot.slane %v99_v23, 4 }
  0x91   :  { %v101_v25 = vadd.f32 %v100_v24, %v99_v23 }
  0x93   :  { %v102_v26 = vrot.slane %v101_v25, 2 }
  0x95   :  { %v103_v27 = vadd.f32 %v102_v26, %v101_v25 }
  0x97   :  { %v104_v28 = vrot.slane %v103_v27, 1 }
  0x99   :  { %v105_v29 = vadd.f32 %v104_v28, %v103_v27 }
  0x9b   :  { %155 = vpush %v105_v29 }
  0xcc   :  { %s156_s0 = spop %155 }
  0xcd   :  { %s107_s1 = sadd.f32 1.000001, %s156_s0 }
  0xcf   :  { %v108_v30 = vstv %s107_s1 }
  0xd0   :  { %166 = vrcp.f32 %v108_v30  ;;  %v120_v35 = vand.u32 2147483648, %v108_v30  ;;  %v118_v38 = vand.u32 2147483647, %v108_v30  ;;  %vm114_vm1 = vweird.f32 %v108_v30 }
  0xd1   :  { %168 = vlog2.f32 %v126_v31 }
  0xd2   :  { %v121_v40 = vor.u32 1.1754944e-38, %v120_v35  ;;  %vm119_vm3 = vcmp.eq.f32.partialorder %v118_v38, 8.507059e+37 }
  0xd6   :  { %v167_v32 = vpop.eup %166 }
  0xd7   :  { %v110_v33 = vmul.f32 %v167_v32, %v108_v30  ;;  %v169_v36 = vpop.eup %168  ;;  %vm115_vm0 = vweird.f32 %v167_v32 }
  0xd8   :  { %vm116_vm2 = vmor %vm114_vm1, %vm115_vm0  ;;  %v128_v41 = vmul.f32 0.6931472, %v169_v36 }
  0xd9   :  { %v111_v34 = vsub.f32 1.0, %v110_v33 }
  0xdb   :  { %v112_v37 = vmul.f32 %v167_v32, %v111_v34 }
  0xdd   :  { %v113_v39 = vadd.f32 %v167_v32, %v112_v37 }
  0xdf   :  { %v117_v42 = vsel %vm116_vm2, %v167_v32, %v113_v39 }
  0xe0   :  { %v122_v43 = vsel %vm119_vm3, %v121_v40, %v117_v42 }
  0xe1   :  { %157 = vpush %v122_v43 }
  0xe2   :  { %159 = vpush %v128_v41 }
 0x112   :  { %s158_s26 = spop %157 }
 0x113   :  { %s124_s27 = smul.f32 1.000001, %s158_s26  ;;  %s160_s28 = spop %159 }
 0x115   :  { %s132_s4 = ssub.f32 %s124_s27, %s281_s2 }
 0x116   :  { %s130_s5 = ssub.f32 %s160_s28, %s124_s27 }
 0x117   :  { %s133_s6 = smul.f32 %s132_s4, %s132_s4 }
 0x118   :  { %s131_s9 = smul.f32 %s130_s5, %s281_s2 }
 0x119   :  { %s134_s13 = smul.f32 0.5, %s133_s6 }
 0x11b   :  { %s135_s14 = sadd.f32 %s134_s13, %s131_s9 }
 0x11d   :  { %137 = sst [smem:[#allocation9]] %s135_s14 }
 0x11e   :  { %146 = dma.smem_to_hbm %s240_s15, 16, %s144_s12, [#allocation6]  }
 0x11f   :  { %234 = dma.done.wait [#allocation6], 16  }
 0x120   :  { %235 = vsyncadd [#allocation6], 4294967280 }
 0x121   :  { %151 = sfence }
 0x122   :  { %152 = vsyncpa [#allocation5], 1 }
 0x123   :  { %153 = vsyncpa [#allocation8], 1 }
 0x124   :  { %154 = vsyncpa [#allocation6], 1 }

</bundles_post_ra>
